<compile_context>
chip_gen: v7x
topology: tpu7x:2x2x1
jax: 0.10.0
libtpu: 0.0.40
codegen_flags: <defaults>
</compile_context>

<pallas_src>
import jax
import jax.numpy as jnp
from jax.experimental import pallas as pl
from jax.experimental.pallas import tpu as pltpu


def _dice_kernel(pred_ref, tgt_ref, out_ref, inter_acc, p_acc, t_acc):
    n = pl.program_id(0)
    j = pl.program_id(1)
    is_first = (n == 0) & (j == 0)
    is_last = (n == pl.num_programs(0) - 1) & (j == pl.num_programs(1) - 1)

    @pl.when(is_first)
    def _():
        inter_acc[...] = jnp.zeros_like(inter_acc)
        p_acc[...] = jnp.zeros_like(p_acc)
        t_acc[...] = jnp.zeros_like(t_acc)

    x = pred_ref[...].astype(jnp.float32)                 # (C, rows, 128)
    # numerically-stable softmax over the leading channel axis; C-leading
    # layout makes these pure elementwise ops across C slabs (VPU only).
    m = jnp.max(x, axis=0, keepdims=True)                 # (1, rows, 128)
    e = jnp.exp(x - m)                                    # (C, rows, 128)
    denom = jnp.sum(e, axis=0)                            # (rows, 128)
    p1 = e[1] * pl.reciprocal(denom, approx=False)        # (rows, 128)

    t = tgt_ref[...].astype(jnp.float32)                  # (rows, 128)

    # elementwise accumulation only; the expensive cross-lane reductions are
    # deferred to the epilogue so the loop stays pure VPU work under the DMA.
    inter_acc[...] += p1 * t
    p_acc[...] += p1
    t_acc[...] += t

    @pl.when(is_last)
    def _():
        smooth = 1.0
        inter = jnp.sum(inter_acc[...], keepdims=True)    # (1, 1)
        sp = jnp.sum(p_acc[...], keepdims=True)
        st = jnp.sum(t_acc[...], keepdims=True)
        out_ref[...] = 1.0 - (2.0 * inter + smooth) / (sp + st + smooth)


def _pick_rows(R, max_rows):
    """Largest legal row-chunk: R itself if small, else a multiple-of-8 divisor."""
    if R <= max_rows:
        return R
    start = max_rows - (max_rows % 8)
    for r in range(start, 7, -8):
        if R % r == 0:
            return r
    return R  # fallback: take the whole row dim (still legal, just a big tile)


def dice_loss(pred, target, *, max_rows=512):
    """pred: (N, C, H, W) float logits, target: (N, H, W) int/float labels."""
    N, C, H, W = pred.shape
    assert C >= 2, "dice_loss uses softmax channel 1; need C >= 2"
    HW = H * W
    assert HW % 128 == 0, "H*W must be a multiple of 128 for this kernel"
    # TODO(synk): pad H*W to a multiple of 128 (masking padded lanes out of the
    # softmax-prob sum) to support arbitrary spatial sizes.
    R = HW // 128
    rows = _pick_rows(R, max_rows)

    # contiguous reshapes only — no HBM transpose, no wrapper dtype casts
    pred4 = pred.reshape(N, C, R, 128)
    tgt3 = target.reshape(N, R, 128)

    grid = (N, R // rows)
    out = pl.pallas_call(
        _dice_kernel,
        out_shape=jax.ShapeDtypeStruct((1, 1), jnp.float32),
        grid_spec=pltpu.PrefetchScalarGridSpec(
            num_scalar_prefetch=0,
            grid=grid,
            in_specs=[
                pl.BlockSpec((pl.Squeezed(), C, rows, 128),
                             lambda n, j: (n, 0, j, 0)),
                pl.BlockSpec((pl.Squeezed(), rows, 128),
                             lambda n, j: (n, j, 0)),
            ],
            out_specs=pl.BlockSpec((1, 1), lambda n, j: (0, 0)),
            scratch_shapes=[
                pltpu.VMEM((rows, 128), jnp.float32),
                pltpu.VMEM((rows, 128), jnp.float32),
                pltpu.VMEM((rows, 128), jnp.float32),
            ],
        ),
        # Both grid axes feed the same resident accumulators -> reductions.
        # (A v7x 2-TC split would need per-core partial outputs combined in
        #  the wrapper; kept single-core-correct here.)
        compiler_params=pltpu.CompilerParams(
            dimension_semantics=("arbitrary", "arbitrary")),
    )(pred4, tgt3)
    return out[0, 0]


def _reference(pred, target):
    probs = jax.nn.softmax(pred.astype(jnp.float32), axis=1)[:, 1, :, :]
    iflat = probs.reshape(-1)
    tflat = target.astype(jnp.float32).reshape(-1)
    inter = jnp.sum(iflat * tflat)
    smooth = 1.0
    return 1.0 - (2.0 * inter + smooth) / (jnp.sum(iflat) + jnp.sum(tflat) + smooth)


if __name__ == "__main__":
    key = jax.random.PRNGKey(0)
    k1, k2 = jax.random.split(key)
    N, C, H, W = 2, 4, 16, 16
    pred = jax.random.normal(k1, (N, C, H, W), dtype=jnp.float32)
    target = jax.random.bernoulli(k2, 0.3, (N, H, W)).astype(jnp.int32)

    loss = jax.block_until_ready(dice_loss(pred, target))

    ref = _reference(pred, target)
    assert jnp.allclose(loss, ref, atol=1e-5, rtol=1e-5), (loss, ref)
    print("KERNEL_OK")
</pallas_src>

<mosaic_0001>
module attributes {stable_mosaic.version = 11 : i64} {
  func.func @_dice_kernel(%arg0: i32, %arg1: i32, %arg2: memref<1x4x2x128xf32, #tpu.memory_space<vmem>>, %arg3: memref<1x2x128xi32, #tpu.memory_space<vmem>>, %arg4: memref<1x1xf32, #tpu.memory_space<vmem>>, %arg5: memref<2x128xf32, #tpu.memory_space<vmem>>, %arg6: memref<2x128xf32, #tpu.memory_space<vmem>>, %arg7: memref<2x128xf32, #tpu.memory_space<vmem>>) attributes {dimension_semantics = [#tpu.dimension_semantics<arbitrary>, #tpu.dimension_semantics<arbitrary>], iteration_bounds = array<i64: 2, 1>, scalar_prefetch = 0 : i64, scratch_operands = 3 : i64, tpu.core_type = #tpu.core_type<tc>, window_params = [{transform_indices = @transform_0, window_bounds = array<i64: 1, 4, 2, 128>}, {transform_indices = @transform_1, window_bounds = array<i64: 1, 2, 128>}, {pipeline_mode = #tpu.pipeline_mode<synchronous>, transform_indices = @transform_2, window_bounds = array<i64: 1, 1>}]} {
    %c0_i32 = arith.constant 0 : i32
    %0 = arith.cmpi eq, %arg0, %c0_i32 : i32
    %c0_i32_0 = arith.constant 0 : i32
    %1 = arith.cmpi eq, %arg1, %c0_i32_0 : i32
    %2 = arith.andi %0, %1 : i1
    %c1_i32 = arith.constant 1 : i32
    %3 = arith.cmpi eq, %arg0, %c1_i32 : i32
    %c0_i32_1 = arith.constant 0 : i32
    %4 = arith.cmpi eq, %arg1, %c0_i32_1 : i32
    %5 = arith.andi %3, %4 : i1
    %6 = arith.extui %2 : i1 to i32
    %c0_i32_2 = arith.constant 0 : i32
    %7 = arith.cmpi ne, %6, %c0_i32_2 : i32
    scf.if %7 {
      %cst_23 = arith.constant 0.000000e+00 : f32
      %35 = vector.broadcast %cst_23 : f32 to vector<2x128xf32>
      %c0_24 = arith.constant 0 : index
      %c0_25 = arith.constant 0 : index
      %36 = vector.load %arg5[%c0_24, %c0_25] : memref<2x128xf32, #tpu.memory_space<vmem>>, vector<2x128xf32>
      tpu.vector_store %arg5[%c0_24, %c0_25], %35 {strides = array<i32>} : memref<2x128xf32, #tpu.memory_space<vmem>>, vector<2x128xf32>,
      %cst_26 = arith.constant 0.000000e+00 : f32
      %37 = vector.broadcast %cst_26 : f32 to vector<2x128xf32>
      %c0_27 = arith.constant 0 : index
      %c0_28 = arith.constant 0 : index
      %38 = vector.load %arg6[%c0_27, %c0_28] : memref<2x128xf32, #tpu.memory_space<vmem>>, vector<2x128xf32>
      tpu.vector_store %arg6[%c0_27, %c0_28], %37 {strides = array<i32>} : memref<2x128xf32, #tpu.memory_space<vmem>>, vector<2x128xf32>,
      %cst_29 = arith.constant 0.000000e+00 : f32
      %39 = vector.broadcast %cst_29 : f32 to vector<2x128xf32>
      %c0_30 = arith.constant 0 : index
      %c0_31 = arith.constant 0 : index
      %40 = vector.load %arg7[%c0_30, %c0_31] : memref<2x128xf32, #tpu.memory_space<vmem>>, vector<2x128xf32>
      tpu.vector_store %arg7[%c0_30, %c0_31], %39 {strides = array<i32>} : memref<2x128xf32, #tpu.memory_space<vmem>>, vector<2x128xf32>,
    } else {
    }
    %c0 = arith.constant 0 : index
    %c0_3 = arith.constant 0 : index
    %c0_4 = arith.constant 0 : index
    %c0_5 = arith.constant 0 : index
    %8 = vector.load %arg2[%c0, %c0_3, %c0_4, %c0_5] : memref<1x4x2x128xf32, #tpu.memory_space<vmem>>, vector<1x4x2x128xf32>
    %9 = vector.shape_cast %8 : vector<1x4x2x128xf32> to vector<4x2x128xf32>
    %cst = arith.constant dense<0xFF800000> : vector<2x128xf32>
    %10 = vector.multi_reduction <maximumf>, %9, %cst [0] : vector<4x2x128xf32> to vector<2x128xf32>
    %11 = vector.shape_cast %10 : vector<2x128xf32> to vector<1x2x128xf32>
    %12 = vector.broadcast %11 : vector<1x2x128xf32> to vector<4x2x128xf32>
    %13 = arith.subf %9, %12 : vector<4x2x128xf32>
    %14 = math.exp %13 : vector<4x2x128xf32>
    %cst_6 = arith.constant dense<0.000000e+00> : vector<2x128xf32>
    %15 = vector.multi_reduction <add>, %14, %cst_6 [0] : vector<4x2x128xf32> to vector<2x128xf32>
    %16 = vector.extract_strided_slice %14 {offsets = [1, 0, 0], sizes = [1, 2, 128], strides = [1, 1, 1]} : vector<4x2x128xf32> to vector<1x2x128xf32>
    %17 = vector.shape_cast %16 : vector<1x2x128xf32> to vector<2x128xf32>
    %18 = tpu.reciprocal %15 : vector<2x128xf32> -> vector<2x128xf32>
    %19 = arith.mulf %17, %18 : vector<2x128xf32>
    %c0_7 = arith.constant 0 : index
    %c0_8 = arith.constant 0 : index
    %c0_9 = arith.constant 0 : index
    %20 = vector.load %arg3[%c0_7, %c0_8, %c0_9] : memref<1x2x128xi32, #tpu.memory_space<vmem>>, vector<1x2x128xi32>
    %21 = vector.shape_cast %20 : vector<1x2x128xi32> to vector<2x128xi32>
    %22 = arith.sitofp %21 : vector<2x128xi32> to vector<2x128xf32>
    %c0_10 = arith.constant 0 : index
    %c0_11 = arith.constant 0 : index
    %23 = vector.load %arg5[%c0_10, %c0_11] : memref<2x128xf32, #tpu.memory_space<vmem>>, vector<2x128xf32>
    %24 = arith.mulf %19, %22 : vector<2x128xf32>
    %25 = arith.addf %23, %24 : vector<2x128xf32>
    %c0_12 = arith.constant 0 : index
    %c0_13 = arith.constant 0 : index
    %26 = vector.load %arg5[%c0_12, %c0_13] : memref<2x128xf32, #tpu.memory_space<vmem>>, vector<2x128xf32>
    tpu.vector_store %arg5[%c0_12, %c0_13], %25 {strides = array<i32>} : memref<2x128xf32, #tpu.memory_space<vmem>>, vector<2x128xf32>,
    %c0_14 = arith.constant 0 : index
    %c0_15 = arith.constant 0 : index
    %27 = vector.load %arg6[%c0_14, %c0_15] : memref<2x128xf32, #tpu.memory_space<vmem>>, vector<2x128xf32>
    %28 = arith.addf %27, %19 : vector<2x128xf32>
    %c0_16 = arith.constant 0 : index
    %c0_17 = arith.constant 0 : index
    %29 = vector.load %arg6[%c0_16, %c0_17] : memref<2x128xf32, #tpu.memory_space<vmem>>, vector<2x128xf32>
    tpu.vector_store %arg6[%c0_16, %c0_17], %28 {strides = array<i32>} : memref<2x128xf32, #tpu.memory_space<vmem>>, vector<2x128xf32>,
    %c0_18 = arith.constant 0 : index
    %c0_19 = arith.constant 0 : index
    %30 = vector.load %arg7[%c0_18, %c0_19] : memref<2x128xf32, #tpu.memory_space<vmem>>, vector<2x128xf32>
    %31 = arith.addf %30, %22 : vector<2x128xf32>
    %c0_20 = arith.constant 0 : index
    %c0_21 = arith.constant 0 : index
    %32 = vector.load %arg7[%c0_20, %c0_21] : memref<2x128xf32, #tpu.memory_space<vmem>>, vector<2x128xf32>
    tpu.vector_store %arg7[%c0_20, %c0_21], %31 {strides = array<i32>} : memref<2x128xf32, #tpu.memory_space<vmem>>, vector<2x128xf32>,
    %33 = arith.extui %5 : i1 to i32
    %c0_i32_22 = arith.constant 0 : i32
    %34 = arith.cmpi ne, %33, %c0_i32_22 : i32
    scf.if %34 {
      %c0_23 = arith.constant 0 : index
      %c0_24 = arith.constant 0 : index
      %35 = vector.load %arg5[%c0_23, %c0_24] : memref<2x128xf32, #tpu.memory_space<vmem>>, vector<2x128xf32>
      %36 = vector.shape_cast %35 : vector<2x128xf32> to vector<1x2x128xf32>
      %cst_25 = arith.constant dense<0.000000e+00> : vector<1xf32>
      %37 = vector.multi_reduction <add>, %36, %cst_25 [1, 2] : vector<1x2x128xf32> to vector<1xf32>
      %38 = vector.shape_cast %37 : vector<1xf32> to vector<1x1x1xf32>
      %39 = vector.extract %38[0, 0, 0] : f32 from vector<1x1x1xf32>
      %40 = vector.broadcast %39 : f32 to vector<1x1xf32>
      %c0_26 = arith.constant 0 : index
      %c0_27 = arith.constant 0 : index
      %41 = vector.load %arg6[%c0_26, %c0_27] : memref<2x128xf32, #tpu.memory_space<vmem>>, vector<2x128xf32>
      %42 = vector.shape_cast %41 : vector<2x128xf32> to vector<1x2x128xf32>
      %cst_28 = arith.constant dense<0.000000e+00> : vector<1xf32>
      %43 = vector.multi_reduction <add>, %42, %cst_28 [1, 2] : vector<1x2x128xf32> to vector<1xf32>
      %44 = vector.shape_cast %43 : vector<1xf32> to vector<1x1x1xf32>
      %45 = vector.extract %44[0, 0, 0] : f32 from vector<1x1x1xf32>
      %46 = vector.broadcast %45 : f32 to vector<1x1xf32>
      %c0_29 = arith.constant 0 : index
      %c0_30 = arith.constant 0 : index
      %47 = vector.load %arg7[%c0_29, %c0_30] : memref<2x128xf32, #tpu.memory_space<vmem>>, vector<2x128xf32>
      %48 = vector.shape_cast %47 : vector<2x128xf32> to vector<1x2x128xf32>
      %cst_31 = arith.constant dense<0.000000e+00> : vector<1xf32>
      %49 = vector.multi_reduction <add>, %48, %cst_31 [1, 2] : vector<1x2x128xf32> to vector<1xf32>
      %50 = vector.shape_cast %49 : vector<1xf32> to vector<1x1x1xf32>
      %51 = vector.extract %50[0, 0, 0] : f32 from vector<1x1x1xf32>
      %52 = vector.broadcast %51 : f32 to vector<1x1xf32>
      %cst_32 = arith.constant 2.000000e+00 : f32
      %53 = vector.broadcast %cst_32 : f32 to vector<1x1xf32>
      %54 = arith.mulf %53, %40 : vector<1x1xf32>
      %cst_33 = arith.constant 1.000000e+00 : f32
      %55 = vector.broadcast %cst_33 : f32 to vector<1x1xf32>
      %56 = arith.addf %54, %55 : vector<1x1xf32>
      %57 = arith.addf %46, %52 : vector<1x1xf32>
      %cst_34 = arith.constant 1.000000e+00 : f32
      %58 = vector.broadcast %cst_34 : f32 to vector<1x1xf32>
      %59 = arith.addf %57, %58 : vector<1x1xf32>
      %60 = arith.divf %56, %59 : vector<1x1xf32>
      %cst_35 = arith.constant 1.000000e+00 : f32
      %61 = vector.broadcast %cst_35 : f32 to vector<1x1xf32>
      %62 = arith.subf %61, %60 : vector<1x1xf32>
      %c0_36 = arith.constant 0 : index
      %c0_37 = arith.constant 0 : index
      %63 = vector.load %arg4[%c0_36, %c0_37] : memref<1x1xf32, #tpu.memory_space<vmem>>, vector<1x1xf32>
      tpu.vector_store %arg4[%c0_36, %c0_37], %62 {strides = array<i32>} : memref<1x1xf32, #tpu.memory_space<vmem>>, vector<1x1xf32>,
    } else {
    }
    return
  }
  func.func @transform_0(%arg0: i32, %arg1: i32) -> (i32, i32, i32, i32) {
    %c0_i32 = arith.constant 0 : i32
    %c0_i32_0 = arith.constant 0 : i32
    %c0_i32_1 = arith.constant 0 : i32
    return %arg0, %c0_i32, %arg1, %c0_i32_0 : i32, i32, i32, i32
  }
  func.func @transform_1(%arg0: i32, %arg1: i32) -> (i32, i32, i32) {
    %c0_i32 = arith.constant 0 : i32
    %c0_i32_0 = arith.constant 0 : i32
    return %arg0, %arg1, %c0_i32 : i32, i32, i32
  }
  func.func @transform_2(%arg0: i32, %arg1: i32) -> (i32, i32) {
    %c0_i32 = arith.constant 0 : i32
    %c0_i32_0 = arith.constant 0 : i32
    %c0_i32_1 = arith.constant 0 : i32
    return %c0_i32, %c0_i32_0 : i32, i32
  }
}

</mosaic_0001>

<bundles_post_ra>
// kernel: tpu_custom_call.1
= control target key start
LH: loop header
LB: loop body
LE: loop exit
PB: predicated region body
PF: predicated region fallthrough
CT: control target
= control target key end

     0   :  { %7 = vsyncpa [#allocation6], 0  ;;  %s880_s0 = inlined_call_operand.hbm [shape: f32[2,4,2,128], index: 0, kind: input, shape index: {}]   ;;  %s881_s1 = inlined_call_operand.hbm [shape: s32[2,2,128], index: 1, kind: input, shape index: {}]   ;;  %s882_s2 = inlined_call_operand.hbm [shape: f32[1,1], index: 2, kind: output, shape index: {}]  }
   0x1   :  { %9 = vsyncpa [#allocation6 + $0x1], 0 }
   0x2   :  { %10 = vsyncpa [#allocation9], 0 }
   0x3   :  { %12 = vsyncpa [#allocation9 + $0x1], 0 }
   0x4   :  { %13 = vsyncpa [#allocation7], 0  ;;  %s676_s9 = smov 0   ;;  %s678_s10 = smov 0  }
   0x5   :  { %s680_s11 = smov 0   ;;  %s682_s12 = smov 0  }
   0x6   :  { %s684_s13 = smov 0   ;;  %s686_s14 = smov 0  }
   0x7 LB: > { %s401_s15 = sadd.s32 4294967295, %s653_s14   ;;  %s31_s16 = sadd.s32 1, %s649_s13  ;;  %s653_s14 = sphi %s686_s14, %s19_s14   ;;  %s649_s13 = sphi %s684_s13, %s895_s13   ;;  %s645_s12 = sphi %s682_s12, %s894_s12   ;;  %s641_s11 = sphi %s680_s11, %s893_s11   ;;  %s637_s10 = sphi %s678_s10, %s892_s10   ;;  %s633_s9 = sphi %s676_s9, %s891_s9  }
   0x8   : > { %p33_p0 = scmp.ge.s32.totalorder %s31_s16, 2  ;;  %s40_s17 = sadd.s32 1, %s641_s11 }
   0x9   : > { %p47_p1 = scmp.ne.s32.totalorder %s641_s11, %s637_s10  ;;  %p48_p2 = scmp.eq.s32.totalorder %s653_s14, 0 }
   0xa   : > { %s897_s16 = smov (%p33_p0, %s31_s16), 0  ;;  %p53_p4 = scmp.ne.s32.totalorder %s637_s10, %s633_s9 }
   0xb   : > { %p712_p3 = por %p48_p2, %p47_p1  ;;  %s35_s19 = ssub.s32 %s649_s13, %s897_s16 }
   0xc   : > { %p54_p5 = scmp.eq.s32.totalorder %s401_s15, 0  ;;  %p38_p6 = scmp.eq.s32.totalorder %s35_s19, 0 }
   0xd   : > { %p442_p8 = scmp.lt.s32.totalorder %s653_s14, 2  ;;  %s730_s22 = sand.u32 1, %s641_s11  }
   0xe   : > { %p721_p7 = por %p54_p5, %p53_p4  ;;  %s418_s23 = sshll.u32 %s649_s13, 7 }
   0xf   : > { %s727_s21 = scalar_select %p38_p6, %s641_s11, %s40_s17  }
  0x10   : > { %s885_s20 = scalar_select %p721_p7, 1, 0 }
  0x11   : > { %s404_s24 = sshll.u32 %s730_s22, 3  ;;  %s737_s27 = scalar_lea.hbm %s880_s0, %s418_s23 }
  0x12   : > { %s130_s28 = scalar_lea.vmem [#allocation5], %s404_s24  ;;  %p741_p9 = pnand %p442_p8, %p712_p3 }
  0x13   : > { %s138_s29 = sshll.u32 %s130_s28, 4  ;;  %s127_s3 = scalar_lea.sflag [#allocation6], %s730_s22  ;;  %s745_s29 = int_to_ptr.vmem [resolvable:$true] %s138_s29 }
  0x14   : > { %s509_s4 = scalar_lea.hbm %s737_s27, 128  ;;  %p511_p11 = pneg %p741_p9 }
  0x15   : > { %p510_p10 = scmp.ne.s32.totalorder %s737_s27, %s509_s4  ;;  %s514_s7 = scalar_lea.hbm %s880_s0, 256 }
  0x16   : > { %p515_p0 = scmp.lt.u32.totalorder %s737_s27, %s880_s0  ;;  %p516_p1 = scmp.lt.u32.totalorder %s514_s7, %s509_s4 }
  0x17   : > { %p512_p12 = pnand %p511_p11, %p510_p10  ;;  %p518_p3 = scmp.lt.u32.totalorder %s509_s4, %s737_s27 }
  0x18   : > { %p517_p2 = por %p516_p1, %p515_p0 }
  0x19   : > { %p513_p13 = pneg %p512_p12 }
  0x1a   : > { %p519_p4 = por %p518_p3, %p517_p2 }
  0x1c   : > { %p520_p5 = pnand %p519_p4, %p513_p13 }
  0x1e   : > { %523 = shalt.err (!%p520_p5)
}
  0x1f   : > { %s524_s17 = scalar_lea.vmem %s745_s29, 128  ;;  %s655_s18 = smov [#allocation5]  }
  0x20   : > { %p525_p6 = scmp.ne.s32.totalorder %s745_s29, %s524_s17  ;;  %s529_s19 = sshll.u32 %s655_s18, 4  ;;  %s530_s19 = int_to_ptr.vmem [resolvable:$false] %s529_s19 }
  0x21   : > { %s531_s23 = scalar_lea.vmem %s530_s19, 256  ;;  %p532_p12 = scmp.lt.s32.totalorder %s745_s29, %s530_s19 }
  0x22   : > { %p527_p8 = pnand %p525_p6, %p511_p11  ;;  %p533_p0 = scmp.lt.s32.totalorder %s531_s23, %s524_s17 }
  0x24   : > { %p528_p10 = pneg %p527_p8  ;;  %p534_p1 = por %p533_p0, %p532_p12 }
  0x26   : > { %p535_p2 = pnand %p534_p1, %p528_p10 }
  0x28   : > { %538 = shalt.err (!%p535_p2)
}
  0x29   : > { %s656_s24 = smov 32   ;;  %s657_s25 = smov 2  }
  0x2a   : > { %438 = dma.hbm_to_vmem [thread:$0]  (!%p741_p9), %s737_s27, 128, %s745_s29, %s127_s3, %s656_s24, %s656_s24, %s657_s25  }
  0x2b   : > { %p409_p13 = scmp.ge.s32.totalorder %s653_s14, 1  ;;  %p165_p3 = scmp.lt.s32.totalorder %s653_s14, 3 }
  0x2c   : > { %s407_s26 = sshll.u32 %s730_s22, 1  ;;  %s408_s4 = sshll.u32 %s649_s13, 5 }
  0x2d   : > { %p778_p4 = pnand %p409_p13, %p165_p3  ;;  %s152_s5 = scalar_lea.vmem [#allocation8], %s407_s26 }
  0x2e   : > { %s160_s6 = sshll.u32 %s152_s5, 4  ;;  %s786_s9 = scalar_lea.hbm %s881_s1, %s408_s4  ;;  %s161_s6 = int_to_ptr.vmem [resolvable:$true] %s160_s6 }
  0x2f   : > { %s887_s28 = scalar_select %p778_p4, 1, 0 }
  0x30   : > { %s149_s27 = scalar_lea.sflag [#allocation9], %s730_s22  ;;  %s539_s29 = scalar_lea.hbm %s786_s9, 32 }
  0x31   : > { %p540_p5 = scmp.ne.s32.totalorder %s786_s9, %s539_s29  ;;  %s544_s18 = scalar_lea.hbm %s881_s1, 64 }
  0x32   : > { %p545_p10 = scmp.lt.u32.totalorder %s786_s9, %s881_s1  ;;  %p546_p12 = scmp.lt.u32.totalorder %s544_s18, %s539_s29 }
  0x33   : > { %p542_p6 = pnand %p540_p5, %p511_p11  ;;  %p548_p1 = scmp.lt.u32.totalorder %s539_s29, %s786_s9 }
  0x34   : > { %p547_p0 = por %p546_p12, %p545_p10 }
  0x35   : > { %p543_p8 = pneg %p542_p6 }
  0x36   : > { %p549_p2 = por %p548_p1, %p547_p0 }
  0x38   : > { %p550_p13 = pnand %p549_p2, %p543_p8 }
  0x3a   : > { %553 = shalt.err (!%p550_p13)
}
  0x3b   : > { %s554_s22 = scalar_lea.vmem %s161_s6, 32  ;;  %s658_s24 = smov [#allocation8]  }
  0x3c   : > { %p555_p3 = scmp.ne.s32.totalorder %s161_s6, %s554_s22  ;;  %s559_s25 = sshll.u32 %s658_s24, 4  ;;  %s560_s25 = int_to_ptr.vmem [resolvable:$false] %s559_s25 }
  0x3d   : > { %s561_s26 = scalar_lea.vmem %s560_s25, 64  ;;  %p562_p7 = scmp.lt.s32.totalorder %s161_s6, %s560_s25 }
  0x3e   : > { %p557_p5 = pnand %p555_p3, %p511_p11  ;;  %p563_p4 = scmp.lt.s32.totalorder %s561_s26, %s554_s22 }
  0x40   : > { %p558_p6 = pneg %p557_p5  ;;  %p564_p10 = por %p563_p4, %p562_p7 }
  0x42   : > { %p565_p12 = pnand %p564_p10, %p558_p6 }
  0x44   : > { %568 = shalt.err (!%p565_p12)
}
  0x45   : > { %441 = dma.hbm_to_vmem [thread:$0]  (!%p741_p9), %s786_s9, 32, %s161_s6, %s149_s27  }
  0x46   : > { %p888_p8 = scmp.ne.s32.totalorder %s887_s28, 0 }
  0x47   : > { %s171_s4 = sand.u32 (!%p888_p8), 1, %s637_s10   ;;  %p889_p11 = scmp.ne.s32.totalorder (!%p888_p8), %s885_s20, 0 }
  0x48   : > { %169 = sbr.rel (%p888_p8) target bundleno = 403 (0x193), region = 28  ;;  %s410_s5 = sshll.u32 (!%p888_p8), %s171_s4, 3 }
  0x49   : > { %s172_s7 = scalar_lea.sflag (!%p888_p8), [#allocation6], %s171_s4  ;;  %s175_s8 = scalar_lea.vmem (!%p888_p8), [#allocation5], %s410_s5 }
  0x4f   : > { %620 = dma.done.wait (%p889_p11), %s172_s7, 128  }
  0x50   : > { %622 = vsyncadd (%p889_p11), %s172_s7, 4294967168  ;;  %s411_s29 = sshll.u32 %s171_s4, 1  ;;  %s181_s3 = scalar_lea.sflag [#allocation9], %s171_s4 }
  0x51   : > { %s184_s30 = scalar_lea.vmem [#allocation8], %s411_s29 }
  0x52   : > { %624 = dma.done.wait (%p889_p11), %s181_s3, 32  }
  0x53   : > { %626 = vsyncadd (%p889_p11), %s181_s3, 4294967264  ;;  %p205_p7 = scmp.eq.s32.totalorder %s645_s12, 0  ;;  %p209_p9 = scmp.eq.s32.totalorder %s645_s12, 1 }
  0x54   : > { %v659_v0 = vmov (%p205_p7), 0.0  }
  0x55   : > { %213 = sbr.rel (!%p205_p7) target bundleno = 92 (0x5c), region = 40  ;;  %214 = vst [vmem:[#allocation2] sm:$0x3] (%p205_p7), %v659_v0  ;;  %215 = vst [vmem:[#allocation3] sm:$0x3] (%p205_p7), %v659_v0 }
  0x56   : > { %216 = vst [vmem:[#allocation4] sm:$0x3] (%p205_p7), %v659_v0 }
  0x5c PF: > { %v217_v1 = vld [vmem:[%s175_s8] sm:$0x3]  ;;  %v218_v2 = vld [vmem:[%s175_s8 + $0x2] sm:$0x3]  ;;  %v219_v3 = vld [vmem:[%s175_s8 + $0x4] sm:$0x3] }
  0x5d   : > { %v220_v4 = vld [vmem:[%s175_s8 + $0x6] sm:$0x3]  ;;  %vm221_vm0 = vcmask 1041408   ;;  %v250_v5 = vld [vmem:[%s184_s30] sm:$0x3]  ;;  %vm307_vm1 = vcmask (%p209_p9), 0  }
  0x5e   : > { %v222_v6 = vsel %vm221_vm0, %v217_v1, -inf  ;;  %v223_v7 = vsel %vm221_vm0, %v218_v2, -inf  ;;  %v224_v8 = vsel %vm221_vm0, %v219_v3, -inf  ;;  %v225_v9 = vsel %vm221_vm0, %v220_v4, -inf  ;;  %v259_v13 = vld [vmem:[#allocation4] sm:$0x3] }
  0x5f   : > { %v226_v10 = vmax.f32 %v222_v6, %v223_v7  ;;  %v227_v11 = vmax.f32 %v224_v8, %v225_v9  ;;  %v251_v12 = vcvt.s32.f32 %v250_v5  ;;  %v256_v36 = vld [vmem:[#allocation3] sm:$0x3]  ;;  %v252_v38 = vld [vmem:[#allocation2] sm:$0x3] }
  0x61   : > { %v228_v14 = vmax.f32 %v226_v10, %v227_v11  ;;  %v260_v15 = vadd.f32 %v259_v13, %v251_v12 }
  0x63   : > { %v229_v16 = vsub.f32 %v217_v1, %v228_v14  ;;  %v230_v17 = vsub.f32 %v218_v2, %v228_v14  ;;  %v231_v18 = vsub.f32 %v219_v3, %v228_v14  ;;  %v232_v19 = vsub.f32 %v220_v4, %v228_v14  ;;  %261 = vst [vmem:[#allocation4] sm:$0x3] %v260_v15 }
  0x65   : > { %v233_v20 = vmul.f32 1.442695, %v229_v16  ;;  %v235_v21 = vmul.f32 1.442695, %v230_v17  ;;  %v237_v22 = vmul.f32 1.442695, %v231_v18 }
  0x66   : > { %v239_v23 = vmul.f32 1.442695, %v232_v19 }
  0x67   : > { %497 = vpow2.f32 %v233_v20 }
  0x68   : > { %499 = vpow2.f32 %v235_v21 }
  0x69   : > { %501 = vpow2.f32 %v237_v22 }
  0x6a   : > { %503 = vpow2.f32 %v239_v23  ;;  %v288_v42 = vld [vmem:[#allocation4] sm:$0x3] (%p209_p9) }
  0x6b   : > { %v289_v45 = vsel (%p209_p9), %vm221_vm0, %v288_v42, 0.0 }
  0x6c   : > { %290 = vadd.xlane.f32.xlu1 (%p209_p9), %v289_v45 }
  0x71   : > { %v498_v24 = vpop.eup %497 }
  0x72   : > { %v500_v25 = vpop.eup %499  ;;  %v241_v26 = vsel %vm221_vm0, %v498_v24, 0.0 }
  0x73   : > { %v502_v27 = vpop.eup %501  ;;  %v242_v28 = vsel %vm221_vm0, %v500_v25, 0.0 }
  0x74   : > { %v504_v29 = vpop.eup %503  ;;  %v243_v30 = vadd.f32 %v242_v28, %v241_v26  ;;  %v244_v31 = vsel %vm221_vm0, %v502_v27, 0.0 }
  0x75   : > { %v246_v32 = vsel %vm221_vm0, %v504_v29, 0.0 }
  0x76   : > { %v245_v33 = vadd.f32 %v244_v31, %v243_v30 }
  0x78   : > { %v247_v34 = vadd.f32 %v246_v32, %v245_v33 }
  0x7a   : > { %505 = vrcp.f32 %v247_v34 }
  0x84   : > { %v506_v35 = vpop.eup %505 }
  0x85   : > { %v249_v37 = vmul.f32 %v506_v35, %v500_v25  ;;  %263 = sbr.rel (!%p209_p9) target bundleno = 378 (0x17a), region = 44 }
  0x87   : > { %v253_v39 = vmul.f32 %v251_v12, %v249_v37  ;;  %v257_v40 = vadd.f32 %v256_v36, %v249_v37 }
  0x89   : > { %v254_v41 = vadd.f32 %v253_v39, %v252_v38  ;;  %258 = vst [vmem:[#allocation3] sm:$0x3] %v257_v40 }
  0x8b   : > { %255 = vst [vmem:[#allocation2] sm:$0x3] %v254_v41 }
  0x90   : > { %v276_v44 = vld [vmem:[#allocation3] sm:$0x3] }
  0x91   : > { %v277_v47 = vsel %vm221_vm0, %v276_v44, 0.0 }
  0x92   : > { %v264_v43 = vld [vmem:[#allocation2] sm:$0x3] }
  0x93   : > { %v265_v46 = vsel %vm221_vm0, %v264_v43, 0.0 }
  0x94   : > { %266 = vadd.xlane.f32.xlu0 %v265_v46 }
  0x98   : > { %278 = vadd.xlane.f32.xlu0 %v277_v47 }
  0xf9   : > { %v291_v48 = vpop.xlane.xlu1 %290 }
  0xfa   : > { %v292_v50 = vrot.slane %v291_v48, 4 }
  0xfc   : > { %v293_v52 = vadd.f32 %v292_v50, %v291_v48 }
  0xfe   : > { %v294_v55 = vrot.slane %v293_v52, 2 }
 0x100   : > { %v295_v60 = vadd.f32 %v294_v55, %v293_v52 }
 0x102   : > { %v296_v1 = vrot.slane %v295_v60, 1 }
 0x104   : > { %v297_v4 = vadd.f32 %v296_v1, %v295_v60 }
 0x121   : > { %v267_v49 = vpop.xlane.xlu0 %266 }
 0x122   : > { %v268_v51 = vrot.slane %v267_v49, 4 }
 0x124   : > { %v269_v53 = vadd.f32 %v268_v51, %v267_v49 }
 0x125   : > { %v279_v54 = vpop.xlane.xlu0 %278 }
 0x126   : > { %v270_v56 = vrot.slane %v269_v53, 2  ;;  %v280_v57 = vrot.slane %v279_v54, 4 }
 0x128   : > { %v281_v58 = vadd.f32 %v280_v57, %v279_v54  ;;  %v271_v59 = vadd.f32 %v270_v56, %v269_v53 }
 0x12a   : > { %v282_v61 = vrot.slane %v281_v58, 2  ;;  %v272_v62 = vrot.slane %v271_v59, 1 }
 0x12c   : > { %v283_v63 = vadd.f32 %v282_v61, %v281_v58  ;;  %v273_v0 = vadd.f32 %v272_v62, %v271_v59 }
 0x12e   : > { %421 = vpush %v273_v0  ;;  %v284_v2 = vrot.slane %v283_v63, 1 }
 0x130   : > { %v285_v3 = vadd.f32 %v284_v2, %v283_v63 }
 0x132   : > { %423 = vpush %v285_v3 }
 0x133   : > { %425 = vpush %v297_v4 }
 0x15f   : > { %s422_s12 = spop %421 }
 0x160   : > { %v275_v9 = vstv %s422_s12 }
 0x161   : > { %v300_v10 = vmul.f32 2.0, %v275_v9 }
 0x163   : > { %s424_s20 = spop %423  ;;  %v301_v11 = vadd.f32 1.0, %v300_v10 }
 0x164   : > { %v287_v5 = vstv %s424_s20  ;;  %s426_s28 = spop %425 }
 0x165   : > { %v299_v6 = vstv %s426_s28 }
 0x166   : > { %v302_v7 = vadd.f32 %v299_v6, %v287_v5 }
 0x168   : > { %v303_v8 = vadd.f32 1.0, %v302_v7 }
 0x16a   : > { %507 = vrcp.f32 %v303_v8 }
 0x174   : > { %v508_v12 = vpop.eup %507 }
 0x175   : > { %v305_v13 = vmul.f32 %v508_v12, %v301_v11 }
 0x177   : > { %v306_v14 = vsub.f32 1.0, %v305_v13 }
 0x179   : > { %308 = vst.msk [vmem:[#allocation10] sm:$0x1] %vm307_vm1, %v306_v14 }
 0x17a PF: > { %p836_p4 = scmp.eq.s32.totalorder %s401_s15, 1  ;;  %s660_s9 = smov [#allocation10]  }
 0x17b   : > { %s316_s27 = sshll.u32 %s660_s9, 4  ;;  %s317_s27 = int_to_ptr.vmem [resolvable:$true] %s316_s27 }
 0x17c   : > { %s569_s17 = scalar_lea.vmem %s317_s27, 16  ;;  %s575_s18 = scalar_lea.vmem %s317_s27, 32 }
 0x17d   : > { %p570_p0 = scmp.ne.s32.totalorder %s317_s27, %s569_s17  ;;  %p576_p13 = scmp.lt.s32.totalorder %s317_s27, %s317_s27 }
 0x17e   : > { %p577_p3 = scmp.lt.s32.totalorder %s575_s18, %s569_s17 }
 0x17f   : > { %p571_p1 = pnand %p570_p0, %p836_p4 }
 0x180   : > { %p578_p5 = por %p577_p3, %p576_p13 }
 0x181   : > { %p572_p2 = pneg %p571_p1 }
 0x183   : > { %p579_p6 = pnand %p578_p5, %p572_p2 }
 0x185   : > { %582 = shalt.err (!%p579_p6)
}
 0x186   : > { %s583_s23 = scalar_lea.hbm %s882_s2, 16 }
 0x187   : > { %p584_p10 = scmp.ne.s32.totalorder %s882_s2, %s583_s23  ;;  %p589_p11 = scmp.lt.u32.totalorder %s583_s23, %s882_s2 }
 0x189   : > { %p585_p12 = pnand %p584_p10, %p836_p4 }
 0x18b   : > { %p586_p8 = pneg %p585_p12 }
 0x18d   : > { %p591_p7 = pnand %p589_p11, %p586_p8 }
 0x18f   : > { %594 = shalt.err (!%p591_p7)
}
 0x190   : > { %432 = dma.vmem_to_hbm [thread:$0]  (%p836_p4), %s317_s27, 16, %s882_s2, [#allocation7]  }
 0x191   : > { %628 = dma.done.wait (%p836_p4), [#allocation7], 16  }
 0x192   : > { %630 = vsyncadd (%p836_p4), [#allocation7], 4294967280 }
 0x193 PF: > { %s19_s14 = sadd.s32 1, %s653_s14   ;;  %s891_s9 = smov %s637_s10 }
 0x194   : > { %p16_p9 = scmp.ge.s32.totalorder %s19_s14, 4   ;;  %s892_s10 = smov %s641_s11 }
 0x195   : > { %s893_s11 = smov %s727_s21  ;;  %s894_s12 = smov %s649_s13 }
 0x196   : > { %s895_s13 = smov %s897_s16  ;;  %18 = sbr.rel (!%p16_p9) target bundleno = 7 (0x7), region = 86 }
 0x19d   :  { %329 = vsyncpa [#allocation6], 1 }
 0x19e   :  { %331 = vsyncpa [#allocation6 + $0x1], 1 }
 0x19f   :  { %332 = vsyncpa [#allocation9], 1 }
 0x1a0   :  { %334 = vsyncpa [#allocation9 + $0x1], 1 }
 0x1a1   :  { %335 = vsyncpa [#allocation7], 1 }
 0x1a2   :  { %337 = vsyncpa [#allocation7 + $0x1], 1 }

</bundles_post_ra>
